<compile_context>
chip_gen: v5e
topology: v5e:2x2
jax: 0.10.0
libtpu: 0.0.40
codegen_flags: <defaults>
</compile_context>

<pallas_src>
import jax
import jax.numpy as jnp
from jax import lax
from jax.experimental import pallas as pl
from jax.experimental.pallas import tpu as pltpu

# ----------------------------- problem sizes --------------------------------
B = 2                         # batch
C, H, W = 4, 16, 16           # video NCHW
S, F = 8, 64                  # phys (seq, feature); feature split at 32
OUT1, OUT2, OUT3 = 16, 16, 16 # out1_dim, out2_dim, out3_dim
NUM_LABEL = 4

DV = C * H * W                # flattened video features       = 1024
DP = S * F                    # flattened phys features (full) = 512
DIN = DV + DP                 # total folded input width       = 1536


# ------------------------------ Pallas kernel --------------------------------
def fused_linear_kernel(vid_ref, phys_ref, wv_ref, wp_ref, b_ref, out_ref):
    # Two MXU matmuls accumulated in f32 + one bias broadcast-add.
    acc = jnp.dot(vid_ref[...], wv_ref[...], preferred_element_type=jnp.float32)
    acc = acc + jnp.dot(phys_ref[...], wp_ref[...],
                        preferred_element_type=jnp.float32)
    out_ref[...] = (acc + b_ref[...]).astype(out_ref.dtype)


# ------------------------------ wrapper ---------------------------------------
def _round_up(x, m):
    return ((x + m - 1) // m) * m


def _choose_tm(b):
    b8 = _round_up(b, 8)
    if b8 <= 256:
        return b8                          # single small step (B=2 -> tm=8)
    # Large B: 256-aligned tile (MXU-friendly on v6e/v7x), >=2 grid steps so
    # the "parallel" axis shards across both v7x TensorCores, capped at 1024
    # rows (12 MB double-buffered activations -> fits every generation).
    return min(1024, _round_up(pl.cdiv(b8, 2), 256))


def modefusion3_forward(vid_X, phys_X, fused):
    """vid_X: (B, C, H, W) f32, phys_X: (B, S, F) f32 -> (B, NUM_LABEL) f32."""
    b = vid_X.shape[0]

    # Layout glue only: both reshapes are contiguous (free); the fused weight
    # rows were permuted at init time to match this natural phys ordering.
    vid = vid_X.reshape(b, DV)             # (B, 1024)
    phys = phys_X.reshape(b, DP)           # (B, 512)

    wv = fused["Wv"]                       # (DV, NUM_LABEL)
    wp = fused["Wp"]                       # (DP, NUM_LABEL), rows permuted
    bias = fused["b"]                      # (1, NUM_LABEL)
    n_out = wv.shape[1]

    tm = _choose_tm(b)
    grid = (pl.cdiv(b, tm),)               # ragged last block: OOB out rows masked

    flops = 2 * b * DIN * n_out
    bytes_accessed = 4 * (b * DIN + DIN * n_out + n_out + b * n_out)

    out = pl.pallas_call(
        fused_linear_kernel,
        out_shape=jax.ShapeDtypeStruct((b, n_out), jnp.float32),
        grid_spec=pltpu.PrefetchScalarGridSpec(
            num_scalar_prefetch=0,
            grid=grid,
            in_specs=[
                pl.BlockSpec((tm, DV), lambda i: (i, 0)),       # video acts
                pl.BlockSpec((tm, DP), lambda i: (i, 0)),       # phys acts
                pl.BlockSpec((DV, n_out), lambda i: (0, 0)),    # folded W (video)
                pl.BlockSpec((DP, n_out), lambda i: (0, 0)),    # folded W (phys)
                pl.BlockSpec((1, n_out), lambda i: (0, 0)),     # folded bias
            ],
            out_specs=pl.BlockSpec((tm, n_out), lambda i: (i, 0)),
        ),
        compiler_params=pltpu.CompilerParams(
            dimension_semantics=("parallel",),
            vmem_limit_bytes=32 * 1024 * 1024),
        cost_estimate=pl.CostEstimate(flops=flops, transcendentals=0,
                                      bytes_accessed=bytes_accessed),
    )(vid, phys, wv, wp, bias)

    return out


# ----------------------- deterministic parameter init ------------------------
def init_params(key):
    def linear(key, fan_in, fan_out):
        kw, kb = jax.random.split(key)
        bound = 1.0 / jnp.sqrt(fan_in)                  # PyTorch Linear default
        w = jax.random.uniform(kw, (fan_in, fan_out), jnp.float32, -bound, bound)
        b = jax.random.uniform(kb, (1, fan_out), jnp.float32, -bound, bound)
        return w, b

    k1, k2, k3, kc = jax.random.split(key, 4)
    w1, b1 = linear(k1, DV, OUT1)
    w2, b2 = linear(k2, S * 32, OUT2)
    w3, b3 = linear(k3, S * 32, OUT3)
    wc, bc = linear(kc, OUT1 + OUT2 + OUT3, NUM_LABEL)
    return dict(w1=w1, b1=b1, w2=w2, b2=b2, w3=w3, b3=b3, wc=wc, bc=bc)


def fuse_params(p):
    """One-time algebraic fold of the (linear) submodels into the combine layer.

    Also permutes the phys rows so the kernel can consume the *natural*
    phys_X.reshape(B, S*F) layout: row s*F + f maps to Wp1[s*32 + f] for
    f < 32 and Wp2[s*32 + (f - 32)] for f >= 32.
    """
    hp = lax.Precision.HIGHEST
    wc = p["wc"]                                                  # (48, L)
    Wv = jnp.dot(p["w1"], wc[:OUT1], precision=hp)                # (DV, L)
    Wp1 = jnp.dot(p["w2"], wc[OUT1:OUT1 + OUT2], precision=hp)    # (256, L)
    Wp2 = jnp.dot(p["w3"], wc[OUT1 + OUT2:], precision=hp)        # (256, L)
    Wp = jnp.concatenate(
        [Wp1.reshape(S, 32, NUM_LABEL), Wp2.reshape(S, 32, NUM_LABEL)],
        axis=1,
    ).reshape(DP, NUM_LABEL)                                      # (512, L)
    b_cat = jnp.concatenate([p["b1"], p["b2"], p["b3"]], axis=1)  # (1, 48)
    b_fused = jnp.dot(b_cat, wc, precision=hp) + p["bc"]          # (1, L)
    return {"Wv": Wv, "Wp": Wp, "b": b_fused}


# -------------------------- plain-JAX reference -------------------------------
def reference_forward(vid_X, phys_X, p):
    b = vid_X.shape[0]
    out_vid = vid_X.reshape(b, -1) @ p["w1"] + p["b1"]
    out_ph1 = phys_X[:, :, :32].reshape(b, -1) @ p["w2"] + p["b2"]
    out_ph2 = phys_X[:, :, 32:].reshape(b, -1) @ p["w3"] + p["b3"]
    cat = jnp.concatenate([out_vid, out_ph1, out_ph2], axis=1)
    return cat @ p["wc"] + p["bc"]


if __name__ == "__main__":
    key = jax.random.PRNGKey(0)
    k_vid, k_phys, k_par = jax.random.split(key, 3)

    vid_X = jax.random.normal(k_vid, (B, C, H, W), jnp.float32)   # NCHW
    phys_X = jax.random.normal(k_phys, (B, S, F), jnp.float32)
    params = init_params(k_par)
    fused = fuse_params(params)           # done once, outside the forward path

    out = modefusion3_forward(vid_X, phys_X, fused)
    out = jax.block_until_ready(out)

    ref = reference_forward(vid_X, phys_X, params)
    assert out.shape == (B, NUM_LABEL)
    assert jnp.allclose(out, ref, atol=1e-4, rtol=1e-4), "mismatch vs JAX reference"

    print("KERNEL_OK")
</pallas_src>

<mosaic_0001>
module attributes {stable_mosaic.version = 11 : i64} {
  func.func @fused_linear_kernel(%arg0: i32, %arg1: memref<8x1024xf32, #tpu.memory_space<vmem>>, %arg2: memref<8x512xf32, #tpu.memory_space<vmem>>, %arg3: memref<1024x4xf32, #tpu.memory_space<vmem>>, %arg4: memref<512x4xf32, #tpu.memory_space<vmem>>, %arg5: memref<1x4xf32, #tpu.memory_space<vmem>>, %arg6: memref<8x4xf32, #tpu.memory_space<vmem>>) attributes {dimension_semantics = [#tpu.dimension_semantics<parallel>], iteration_bounds = array<i64: 1>, scalar_prefetch = 0 : i64, scratch_operands = 0 : i64, tpu.core_type = #tpu.core_type<tc>, window_params = [{transform_indices = @transform_0, window_bounds = array<i64: 8, 1024>}, {transform_indices = @transform_1, window_bounds = array<i64: 8, 512>}, {pipeline_mode = #tpu.pipeline_mode<synchronous>, transform_indices = @transform_2, window_bounds = array<i64: 1024, 4>}, {pipeline_mode = #tpu.pipeline_mode<synchronous>, transform_indices = @transform_3, window_bounds = array<i64: 512, 4>}, {pipeline_mode = #tpu.pipeline_mode<synchronous>, transform_indices = @transform_4, window_bounds = array<i64: 1, 4>}, {transform_indices = @transform_5, window_bounds = array<i64: 8, 4>}]} {
    %c0 = arith.constant 0 : index
    %c0_0 = arith.constant 0 : index
    %0 = vector.load %arg1[%c0, %c0_0] : memref<8x1024xf32, #tpu.memory_space<vmem>>, vector<8x1024xf32>
    %c0_1 = arith.constant 0 : index
    %c0_2 = arith.constant 0 : index
    %1 = vector.load %arg3[%c0_1, %c0_2] : memref<1024x4xf32, #tpu.memory_space<vmem>>, vector<1024x4xf32>
    %cst = arith.constant dense<0.000000e+00> : vector<8x4xf32>
    %2 = tpu.matmul %0, %1, %cst {dimension_numbers = #tpu.dot_dimension_numbers<[1], [0], [0], [1], [0, 0, 1, 1], [], []>} : vector<8x1024xf32>, vector<1024x4xf32>, vector<8x4xf32> -> vector<8x4xf32>
    %c0_3 = arith.constant 0 : index
    %c0_4 = arith.constant 0 : index
    %3 = vector.load %arg2[%c0_3, %c0_4] : memref<8x512xf32, #tpu.memory_space<vmem>>, vector<8x512xf32>
    %c0_5 = arith.constant 0 : index
    %c0_6 = arith.constant 0 : index
    %4 = vector.load %arg4[%c0_5, %c0_6] : memref<512x4xf32, #tpu.memory_space<vmem>>, vector<512x4xf32>
    %cst_7 = arith.constant dense<0.000000e+00> : vector<8x4xf32>
    %5 = tpu.matmul %3, %4, %cst_7 {dimension_numbers = #tpu.dot_dimension_numbers<[1], [0], [0], [1], [0, 0, 1, 1], [], []>} : vector<8x512xf32>, vector<512x4xf32>, vector<8x4xf32> -> vector<8x4xf32>
    %6 = arith.addf %2, %5 : vector<8x4xf32>
    %c0_8 = arith.constant 0 : index
    %c0_9 = arith.constant 0 : index
    %7 = vector.load %arg5[%c0_8, %c0_9] : memref<1x4xf32, #tpu.memory_space<vmem>>, vector<1x4xf32>
    %8 = vector.broadcast %7 : vector<1x4xf32> to vector<8x4xf32>
    %9 = arith.addf %6, %8 : vector<8x4xf32>
    %c0_10 = arith.constant 0 : index
    %c0_11 = arith.constant 0 : index
    %10 = vector.load %arg6[%c0_10, %c0_11] : memref<8x4xf32, #tpu.memory_space<vmem>>, vector<8x4xf32>
    tpu.vector_store %arg6[%c0_10, %c0_11], %9 {strides = array<i32>} : memref<8x4xf32, #tpu.memory_space<vmem>>, vector<8x4xf32>,
    return
  }
  func.func @transform_0(%arg0: i32) -> (i32, i32) {
    %c0_i32 = arith.constant 0 : i32
    %c0_i32_0 = arith.constant 0 : i32
    return %arg0, %c0_i32 : i32, i32
  }
  func.func @transform_1(%arg0: i32) -> (i32, i32) {
    %c0_i32 = arith.constant 0 : i32
    %c0_i32_0 = arith.constant 0 : i32
    return %arg0, %c0_i32 : i32, i32
  }
  func.func @transform_2(%arg0: i32) -> (i32, i32) {
    %c0_i32 = arith.constant 0 : i32
    %c0_i32_0 = arith.constant 0 : i32
    %c0_i32_1 = arith.constant 0 : i32
    return %c0_i32, %c0_i32_0 : i32, i32
  }
  func.func @transform_3(%arg0: i32) -> (i32, i32) {
    %c0_i32 = arith.constant 0 : i32
    %c0_i32_0 = arith.constant 0 : i32
    %c0_i32_1 = arith.constant 0 : i32
    return %c0_i32, %c0_i32_0 : i32, i32
  }
  func.func @transform_4(%arg0: i32) -> (i32, i32) {
    %c0_i32 = arith.constant 0 : i32
    %c0_i32_0 = arith.constant 0 : i32
    %c0_i32_1 = arith.constant 0 : i32
    return %c0_i32, %c0_i32_0 : i32, i32
  }
  func.func @transform_5(%arg0: i32) -> (i32, i32) {
    %c0_i32 = arith.constant 0 : i32
    %c0_i32_0 = arith.constant 0 : i32
    return %arg0, %c0_i32 : i32, i32
  }
}

</mosaic_0001>

<bundles_post_ra>
// kernel: tpu_custom_call.1
= control target key start
LH: loop header
LB: loop body
LE: loop exit
PB: predicated region body
PF: predicated region fallthrough
CT: control target
= control target key end

     0   :  { %10 = vsyncpa [#allocation3], 0  ;;  %vm528_vm0 = vcmask 31744   ;;  %s1229_s0 = inlined_call_operand.vmem [shape: f32[2,1024], index: 0, kind: input, shape index: {}]   ;;  %s1230_s1 = inlined_call_operand.vmem [shape: f32[2,512], index: 1, kind: input, shape index: {}]   ;;  %s1231_s2 = inlined_call_operand.vmem [shape: f32[1024,4], index: 2, kind: input, shape index: {}]   ;;  %s1232_s3 = inlined_call_operand.vmem [shape: f32[512,4], index: 3, kind: input, shape index: {}]   ;;  %s1233_s4 = inlined_call_operand.vmem [shape: f32[1,4], index: 4, kind: input, shape index: {}]   ;;  %s1234_s5 = inlined_call_operand.hbm [shape: f32[2,4], index: 5, kind: output, shape index: {}]  }
   0x1   :  { %v176_v0 = vld [vmem:[%s1232_s3 + $0x78] sm:$0xff]  ;;  %v175_v2 = vld [vmem:[%s1232_s3 + $0x70] sm:$0xff]  ;;  %v174_v6 = vld [vmem:[%s1232_s3 + $0x68] sm:$0xff] }
   0x2   :  { %v208_v1 = vld [vmem:[%s1232_s3 + $0x178] sm:$0xff]  ;;  %244 = vmatpush.msra.mxu0 %v176_v0  ;;  %v207_v4 = vld [vmem:[%s1232_s3 + $0x170] sm:$0xff]  ;;  %v206_v8 = vld [vmem:[%s1232_s3 + $0x168] sm:$0xff] }
   0x3   :  { %284 = vmatpush.msra.mxu2 %v208_v1  ;;  %v192_v3 = vld [vmem:[%s1232_s3 + $0xf8] sm:$0xff]  ;;  %v191_v7 = vld [vmem:[%s1232_s3 + $0xf0] sm:$0xff]  ;;  %v173_v10 = vld [vmem:[%s1232_s3 + $0x60] sm:$0xff] }
   0x4   :  { %264 = vmatpush.msra.mxu1 %v192_v3  ;;  %v224_v5 = vld [vmem:[%s1232_s3 + $0x1f8] sm:$0xff]  ;;  %245 = vmatpush.msra.mxu0 %v175_v2  ;;  %v223_v9 = vld [vmem:[%s1232_s3 + $0x1f0] sm:$0xff]  ;;  %v190_v11 = vld [vmem:[%s1232_s3 + $0xe8] sm:$0xff] }
   0x5   :  { %285 = vmatpush.msra.mxu2 %v207_v4  ;;  %304 = vmatpush.msra.mxu3 %v224_v5  ;;  %v205_v12 = vld [vmem:[%s1232_s3 + $0x160] sm:$0xff]  ;;  %v222_v13 = vld [vmem:[%s1232_s3 + $0x1e8] sm:$0xff]  ;;  %v172_v15 = vld [vmem:[%s1232_s3 + $0x58] sm:$0xff] }
   0x6   :  { %265 = vmatpush.msra.mxu1 %v191_v7  ;;  %246 = vmatpush.msra.mxu0 %v174_v6  ;;  %v189_v14 = vld [vmem:[%s1232_s3 + $0xe0] sm:$0xff]  ;;  %v204_v16 = vld [vmem:[%s1232_s3 + $0x158] sm:$0xff]  ;;  %v171_v19 = vld [vmem:[%s1232_s3 + $0x50] sm:$0xff] }
   0x7   :  { %286 = vmatpush.msra.mxu2 %v206_v8  ;;  %305 = vmatpush.msra.mxu3 %v223_v9  ;;  %v221_v17 = vld [vmem:[%s1232_s3 + $0x1e0] sm:$0xff]  ;;  %v188_v18 = vld [vmem:[%s1232_s3 + $0xd8] sm:$0xff]  ;;  %v203_v20 = vld [vmem:[%s1232_s3 + $0x150] sm:$0xff] }
   0x8   :  { %266 = vmatpush.msra.mxu1 %v190_v11  ;;  %247 = vmatpush.msra.mxu0 %v173_v10  ;;  %v220_v21 = vld [vmem:[%s1232_s3 + $0x1d8] sm:$0xff]  ;;  %v187_v22 = vld [vmem:[%s1232_s3 + $0xd0] sm:$0xff]  ;;  %v170_v23 = vld [vmem:[%s1232_s3 + $0x48] sm:$0xff] }
   0x9   :  { %287 = vmatpush.msra.mxu2 %v205_v12  ;;  %306 = vmatpush.msra.mxu3 %v222_v13  ;;  %v202_v24 = vld [vmem:[%s1232_s3 + $0x148] sm:$0xff]  ;;  %v219_v25 = vld [vmem:[%s1232_s3 + $0x1d0] sm:$0xff]  ;;  %v169_v27 = vld [vmem:[%s1232_s3 + $0x40] sm:$0xff] }
   0xa   :  { %267 = vmatpush.msra.mxu1 %v189_v14  ;;  %248 = vmatpush.msra.mxu0 %v172_v15  ;;  %v186_v26 = vld [vmem:[%s1232_s3 + $0xc8] sm:$0xff]  ;;  %v201_v28 = vld [vmem:[%s1232_s3 + $0x140] sm:$0xff]  ;;  %v168_v31 = vld [vmem:[%s1232_s3 + $0x38] sm:$0xff] }
   0xb   :  { %288 = vmatpush.msra.mxu2 %v204_v16  ;;  %307 = vmatpush.msra.mxu3 %v221_v17  ;;  %v218_v29 = vld [vmem:[%s1232_s3 + $0x1c8] sm:$0xff]  ;;  %v185_v30 = vld [vmem:[%s1232_s3 + $0xc0] sm:$0xff]  ;;  %v200_v32 = vld [vmem:[%s1232_s3 + $0x138] sm:$0xff] }
   0xc   :  { %268 = vmatpush.msra.mxu1 %v188_v18  ;;  %249 = vmatpush.msra.mxu0 %v171_v19  ;;  %v217_v33 = vld [vmem:[%s1232_s3 + $0x1c0] sm:$0xff]  ;;  %v184_v34 = vld [vmem:[%s1232_s3 + $0xb8] sm:$0xff]  ;;  %v167_v35 = vld [vmem:[%s1232_s3 + $0x30] sm:$0xff] }
   0xd   :  { %289 = vmatpush.msra.mxu2 %v203_v20  ;;  %308 = vmatpush.msra.mxu3 %v220_v21  ;;  %v199_v36 = vld [vmem:[%s1232_s3 + $0x130] sm:$0xff]  ;;  %v216_v37 = vld [vmem:[%s1232_s3 + $0x1b8] sm:$0xff]  ;;  %v166_v39 = vld [vmem:[%s1232_s3 + $0x28] sm:$0xff] }
   0xe   :  { %269 = vmatpush.msra.mxu1 %v187_v22  ;;  %250 = vmatpush.msra.mxu0 %v170_v23  ;;  %v183_v38 = vld [vmem:[%s1232_s3 + $0xb0] sm:$0xff]  ;;  %v198_v40 = vld [vmem:[%s1232_s3 + $0x128] sm:$0xff]  ;;  %v165_v43 = vld [vmem:[%s1232_s3 + $0x20] sm:$0xff] }
   0xf   :  { %290 = vmatpush.msra.mxu2 %v202_v24  ;;  %309 = vmatpush.msra.mxu3 %v219_v25  ;;  %v215_v41 = vld [vmem:[%s1232_s3 + $0x1b0] sm:$0xff]  ;;  %v182_v42 = vld [vmem:[%s1232_s3 + $0xa8] sm:$0xff]  ;;  %v197_v44 = vld [vmem:[%s1232_s3 + $0x120] sm:$0xff] }
  0x10   :  { %270 = vmatpush.msra.mxu1 %v186_v26  ;;  %251 = vmatpush.msra.mxu0 %v169_v27  ;;  %v214_v45 = vld [vmem:[%s1232_s3 + $0x1a8] sm:$0xff]  ;;  %v181_v46 = vld [vmem:[%s1232_s3 + $0xa0] sm:$0xff]  ;;  %v164_v47 = vld [vmem:[%s1232_s3 + $0x18] sm:$0xff] }
  0x11   :  { %291 = vmatpush.msra.mxu2 %v201_v28  ;;  %310 = vmatpush.msra.mxu3 %v218_v29  ;;  %v196_v48 = vld [vmem:[%s1232_s3 + $0x118] sm:$0xff]  ;;  %v213_v49 = vld [vmem:[%s1232_s3 + $0x1a0] sm:$0xff]  ;;  %v163_v51 = vld [vmem:[%s1232_s3 + $0x10] sm:$0xff] }
  0x12   :  { %271 = vmatpush.msra.mxu1 %v185_v30  ;;  %252 = vmatpush.msra.mxu0 %v168_v31  ;;  %v180_v50 = vld [vmem:[%s1232_s3 + $0x98] sm:$0xff]  ;;  %v195_v52 = vld [vmem:[%s1232_s3 + $0x110] sm:$0xff]  ;;  %v162_v55 = vld [vmem:[%s1232_s3 + $0x8] sm:$0xff] }
  0x13   :  { %292 = vmatpush.msra.mxu2 %v200_v32  ;;  %311 = vmatpush.msra.mxu3 %v217_v33  ;;  %v212_v53 = vld [vmem:[%s1232_s3 + $0x198] sm:$0xff]  ;;  %v179_v54 = vld [vmem:[%s1232_s3 + $0x90] sm:$0xff]  ;;  %v194_v56 = vld [vmem:[%s1232_s3 + $0x108] sm:$0xff] }
  0x14   :  { %272 = vmatpush.msra.mxu1 %v184_v34  ;;  %253 = vmatpush.msra.mxu0 %v167_v35  ;;  %v211_v57 = vld [vmem:[%s1232_s3 + $0x190] sm:$0xff]  ;;  %v178_v58 = vld [vmem:[%s1232_s3 + $0x88] sm:$0xff]  ;;  %v161_v59 = vld [vmem:[%s1232_s3] sm:$0xff] }
  0x15   :  { %293 = vmatpush.msra.mxu2 %v199_v36  ;;  %312 = vmatpush.msra.mxu3 %v216_v37  ;;  %v193_v60 = vld [vmem:[%s1232_s3 + $0x100] sm:$0xff]  ;;  %v210_v61 = vld [vmem:[%s1232_s3 + $0x188] sm:$0xff]  ;;  %v44_v62 = vld [vmem:[%s1231_s2 + $0x78] sm:$0xff] }
  0x16   :  { %273 = vmatpush.msra.mxu1 %v183_v38  ;;  %254 = vmatpush.msra.mxu0 %v166_v39  ;;  %v76_v63 = vld [vmem:[%s1231_s2 + $0x178] sm:$0xff]  ;;  %v177_v0 = vld [vmem:[%s1232_s3 + $0x80] sm:$0xff]  ;;  %v43_v2 = vld [vmem:[%s1231_s2 + $0x70] sm:$0xff] }
  0x17   :  { %294 = vmatpush.msra.mxu2 %v198_v40  ;;  %313 = vmatpush.msra.mxu3 %v215_v41  ;;  %v209_v1 = vld [vmem:[%s1232_s3 + $0x180] sm:$0xff]  ;;  %v60_v3 = vld [vmem:[%s1231_s2 + $0xf8] sm:$0xff]  ;;  %v75_v4 = vld [vmem:[%s1231_s2 + $0x170] sm:$0xff] }
  0x18   :  { %274 = vmatpush.msra.mxu1 %v182_v42  ;;  %255 = vmatpush.msra.mxu0 %v165_v43  ;;  %v92_v5 = vld [vmem:[%s1231_s2 + $0x1f8] sm:$0xff]  ;;  %v42_v6 = vld [vmem:[%s1231_s2 + $0x68] sm:$0xff]  ;;  %v59_v7 = vld [vmem:[%s1231_s2 + $0xf0] sm:$0xff] }
  0x19   :  { %295 = vmatpush.msra.mxu2 %v197_v44  ;;  %314 = vmatpush.msra.mxu3 %v214_v45  ;;  %v74_v8 = vld [vmem:[%s1231_s2 + $0x168] sm:$0xff]  ;;  %v91_v9 = vld [vmem:[%s1231_s2 + $0x1f0] sm:$0xff]  ;;  %v41_v10 = vld [vmem:[%s1231_s2 + $0x60] sm:$0xff] }
  0x1a   :  { %275 = vmatpush.msra.mxu1 %v181_v46  ;;  %256 = vmatpush.msra.mxu0 %v164_v47  ;;  %v58_v11 = vld [vmem:[%s1231_s2 + $0xe8] sm:$0xff]  ;;  %v73_v12 = vld [vmem:[%s1231_s2 + $0x160] sm:$0xff]  ;;  %v40_v14 = vld [vmem:[%s1231_s2 + $0x58] sm:$0xff] }
  0x1b   :  { %296 = vmatpush.msra.mxu2 %v196_v48  ;;  %315 = vmatpush.msra.mxu3 %v213_v49  ;;  %v90_v13 = vld [vmem:[%s1231_s2 + $0x1e8] sm:$0xff]  ;;  %v57_v15 = vld [vmem:[%s1231_s2 + $0xe0] sm:$0xff]  ;;  %v72_v16 = vld [vmem:[%s1231_s2 + $0x158] sm:$0xff] }
  0x1c   :  { %276 = vmatpush.msra.mxu1 %v180_v50  ;;  %257 = vmatpush.msra.mxu0 %v163_v51  ;;  %v89_v17 = vld [vmem:[%s1231_s2 + $0x1e0] sm:$0xff]  ;;  %v39_v18 = vld [vmem:[%s1231_s2 + $0x50] sm:$0xff]  ;;  %v56_v19 = vld [vmem:[%s1231_s2 + $0xd8] sm:$0xff] }
  0x1d   :  { %297 = vmatpush.msra.mxu2 %v195_v52  ;;  %316 = vmatpush.msra.mxu3 %v212_v53  ;;  %v71_v20 = vld [vmem:[%s1231_s2 + $0x150] sm:$0xff]  ;;  %v88_v21 = vld [vmem:[%s1231_s2 + $0x1d8] sm:$0xff]  ;;  %v38_v22 = vld [vmem:[%s1231_s2 + $0x48] sm:$0xff] }
  0x1e   :  { %277 = vmatpush.msra.mxu1 %v179_v54  ;;  %258 = vmatpush.msra.mxu0 %v162_v55  ;;  %v157_v23 = vld [vmem:[%s1230_s1] sm:$0xff]  ;;  %v158_v24 = vld [vmem:[%s1230_s1 + $0x8] sm:$0xff]  ;;  %v159_v25 = vld [vmem:[%s1230_s1 + $0x10] sm:$0xff] }
  0x1f   :  { %298 = vmatpush.msra.mxu2 %v194_v56  ;;  %317 = vmatpush.msra.mxu3 %v211_v57  ;;  %v55_v26 = vld [vmem:[%s1231_s2 + $0xd0] sm:$0xff]  ;;  %v70_v27 = vld [vmem:[%s1231_s2 + $0x148] sm:$0xff]  ;;  %v160_v28 = vld [vmem:[%s1230_s1 + $0x18] sm:$0xff]  ;;  %229 = vst [vmem:[#allocation1] ss:$4 sm:$0xff] %v157_v23 }
  0x20   :  { %278 = vmatpush.msra.mxu1 %v178_v58  ;;  %259 = vmatpush.msra.mxu0 %v161_v59  ;;  %v87_v29 = vld [vmem:[%s1231_s2 + $0x1d0] sm:$0xff]  ;;  %v37_v30 = vld [vmem:[%s1231_s2 + $0x40] sm:$0xff]  ;;  %231 = vst [vmem:[#allocation1 + $0x1] ss:$4 sm:$0xff] %v158_v24  ;;  %v54_v31 = vld [vmem:[%s1231_s2 + $0xc8] sm:$0xff] }
  0x21   :  { %299 = vmatpush.msra.mxu2 %v193_v60  ;;  %318 = vmatpush.msra.mxu3 %v210_v61  ;;  %v69_v32 = vld [vmem:[%s1231_s2 + $0x140] sm:$0xff]  ;;  %233 = vst [vmem:[#allocation1 + $0x2] ss:$4 sm:$0xff] %v159_v25  ;;  %v86_v33 = vld [vmem:[%s1231_s2 + $0x1c8] sm:$0xff]  ;;  %v36_v34 = vld [vmem:[%s1231_s2 + $0x38] sm:$0xff] }
  0x22   :  { %363 = vmatpush.msrb.mxu0 %v44_v62  ;;  %279 = vmatpush.msra.mxu1 %v177_v0  ;;  %235 = vst [vmem:[#allocation1 + $0x3] ss:$4 sm:$0xff] %v160_v28  ;;  %v53_v35 = vld [vmem:[%s1231_s2 + $0xc0] sm:$0xff]  ;;  %v68_v36 = vld [vmem:[%s1231_s2 + $0x138] sm:$0xff]  ;;  %v35_v38 = vld [vmem:[%s1231_s2 + $0x30] sm:$0xff] }
  0x23   :  { %403 = vmatpush.msrb.mxu2 %v76_v63  ;;  %319 = vmatpush.msra.mxu3 %v209_v1  ;;  %v85_v37 = vld [vmem:[%s1231_s2 + $0x1c0] sm:$0xff]  ;;  %v52_v39 = vld [vmem:[%s1231_s2 + $0xb8] sm:$0xff]  ;;  %v67_v40 = vld [vmem:[%s1231_s2 + $0x130] sm:$0xff] }
  0x24   :  { %364 = vmatpush.msrb.mxu0 %v43_v2  ;;  %383 = vmatpush.msrb.mxu1 %v60_v3  ;;  %v84_v41 = vld [vmem:[%s1231_s2 + $0x1b8] sm:$0xff]  ;;  %v34_v42 = vld [vmem:[%s1231_s2 + $0x28] sm:$0xff]  ;;  %v51_v43 = vld [vmem:[%s1231_s2 + $0xb0] sm:$0xff] }
  0x25   :  { %404 = vmatpush.msrb.mxu2 %v75_v4  ;;  %423 = vmatpush.msrb.mxu3 %v92_v5  ;;  %v66_v44 = vld [vmem:[%s1231_s2 + $0x128] sm:$0xff]  ;;  %v83_v45 = vld [vmem:[%s1231_s2 + $0x1b0] sm:$0xff]  ;;  %v33_v46 = vld [vmem:[%s1231_s2 + $0x20] sm:$0xff] }
  0x26   :  { %365 = vmatpush.msrb.mxu0 %v42_v6  ;;  %384 = vmatpush.msrb.mxu1 %v59_v7  ;;  %v50_v47 = vld [vmem:[%s1231_s2 + $0xa8] sm:$0xff]  ;;  %v65_v48 = vld [vmem:[%s1231_s2 + $0x120] sm:$0xff]  ;;  %v32_v50 = vld [vmem:[%s1231_s2 + $0x18] sm:$0xff] }
  0x27   :  { %405 = vmatpush.msrb.mxu2 %v74_v8  ;;  %424 = vmatpush.msrb.mxu3 %v91_v9  ;;  %v82_v49 = vld [vmem:[%s1231_s2 + $0x1a8] sm:$0xff]  ;;  %v21_v51 = vld [vmem:[%s1229_s0] sm:$0xff]  ;;  %v23_v52 = vld [vmem:[%s1229_s0 + $0x10] sm:$0xff] }
  0x28   :  { %366 = vmatpush.msrb.mxu0 %v41_v10  ;;  %385 = vmatpush.msrb.mxu1 %v58_v11  ;;  %v25_v53 = vld [vmem:[%s1229_s0 + $0x20] sm:$0xff]  ;;  %v64_v59 = vld [vmem:[%s1231_s2 + $0x118] sm:$0xff]  ;;  %v27_v60 = vld [vmem:[%s1229_s0 + $0x30] sm:$0xff] }
  0x29   :  { %406 = vmatpush.msrb.mxu2 %v73_v12  ;;  %425 = vmatpush.msrb.mxu3 %v90_v13  ;;  %v238_v54 = vld.sshfl [vmem:[#allocation1 + $0x10] sm:$0xff pattern:$0x73625140]  ;;  %v236_v55 = vld.sshfl [vmem:[#allocation1] sm:$0xff pattern:$0x73625140] }
  0x2a   :  { %367 = vmatpush.msrb.mxu0 %v40_v14  ;;  %386 = vmatpush.msrb.mxu1 %v57_v15  ;;  %v239_v56 = vld.sshfl [vmem:[#allocation1 + $0x18] sm:$0xff pattern:$0x73625140]  ;;  %v237_v57 = vld.sshfl [vmem:[#allocation1 + $0x8] sm:$0xff pattern:$0x73625140] }
  0x2b   :  { %407 = vmatpush.msrb.mxu2 %v72_v16  ;;  %426 = vmatpush.msrb.mxu3 %v89_v17  ;;  %v49_v58 = vld [vmem:[%s1231_s2 + $0xa0] sm:$0xff]  ;;  %332 = vst [vmem:[#allocation1] ss:$4 sm:$0xff] %v21_v51  ;;  %v31_v62 = vld [vmem:[%s1231_s2 + $0x10] sm:$0xff]  ;;  %v48_v63 = vld [vmem:[%s1231_s2 + $0x98] sm:$0xff] }
  0x2c   :  { %368 = vmatpush.msrb.mxu0 %v39_v18  ;;  %387 = vmatpush.msrb.mxu1 %v56_v19  ;;  %v81_v61 = vld [vmem:[%s1231_s2 + $0x1a0] sm:$0xff]  ;;  %334 = vst [vmem:[#allocation1 + $0x1] ss:$4 sm:$0xff] %v23_v52  ;;  %v63_v0 = vld [vmem:[%s1231_s2 + $0x110] sm:$0xff]  ;;  %v80_v1 = vld [vmem:[%s1231_s2 + $0x198] sm:$0xff] }
  0x2d   :  { %408 = vmatpush.msrb.mxu2 %v71_v20  ;;  %427 = vmatpush.msrb.mxu3 %v88_v21  ;;  %336 = vst [vmem:[#allocation1 + $0x2] ss:$4 sm:$0xff] %v25_v53  ;;  %v30_v2 = vld [vmem:[%s1231_s2 + $0x8] sm:$0xff]  ;;  %v47_v3 = vld [vmem:[%s1231_s2 + $0x90] sm:$0xff]  ;;  %v29_v6 = vld [vmem:[%s1231_s2] sm:$0xff] }
  0x2e   :  { %369 = vmatpush.msrb.mxu0 %v38_v22  ;;  %388 = vmatpush.msrb.mxu1 %v55_v26  ;;  %338 = vst [vmem:[#allocation1 + $0x3] ss:$4 sm:$0xff] %v27_v60  ;;  %v62_v4 = vld [vmem:[%s1231_s2 + $0x108] sm:$0xff]  ;;  %v79_v5 = vld [vmem:[%s1231_s2 + $0x190] sm:$0xff]  ;;  %v61_v8 = vld [vmem:[%s1231_s2 + $0x100] sm:$0xff] }
  0x2f   :  { %409 = vmatpush.msrb.mxu2 %v70_v27  ;;  %428 = vmatpush.msrb.mxu3 %v87_v29  ;;  %v46_v7 = vld [vmem:[%s1231_s2 + $0x88] sm:$0xff]  ;;  %v108_v10 = vld [vmem:[%s1231_s2 + $0x278] sm:$0xff]  ;;  %v45_v12 = vld [vmem:[%s1231_s2 + $0x80] sm:$0xff] }
  0x30   :  { %370 = vmatpush.msrb.mxu0 %v37_v30  ;;  %389 = vmatpush.msrb.mxu1 %v54_v31  ;;  %v78_v9 = vld [vmem:[%s1231_s2 + $0x188] sm:$0xff]  ;;  %v140_v11 = vld [vmem:[%s1231_s2 + $0x378] sm:$0xff]  ;;  %v77_v13 = vld [vmem:[%s1231_s2 + $0x180] sm:$0xff] }
  0x31   :  { %410 = vmatpush.msrb.mxu2 %v69_v32  ;;  %429 = vmatpush.msrb.mxu3 %v86_v33  ;;  %v107_v14 = vld [vmem:[%s1231_s2 + $0x270] sm:$0xff]  ;;  %v124_v15 = vld [vmem:[%s1231_s2 + $0x2f8] sm:$0xff]  ;;  %v106_v18 = vld [vmem:[%s1231_s2 + $0x268] sm:$0xff] }
  0x32   :  { %371 = vmatpush.msrb.mxu0 %v36_v34  ;;  %390 = vmatpush.msrb.mxu1 %v53_v35  ;;  %v139_v16 = vld [vmem:[%s1231_s2 + $0x370] sm:$0xff]  ;;  %v156_v17 = vld [vmem:[%s1231_s2 + $0x3f8] sm:$0xff]  ;;  %v138_v20 = vld [vmem:[%s1231_s2 + $0x368] sm:$0xff] }
  0x33   :  { %411 = vmatpush.msrb.mxu2 %v68_v36  ;;  %430 = vmatpush.msrb.mxu3 %v85_v37  ;;  %v123_v19 = vld [vmem:[%s1231_s2 + $0x2f0] sm:$0xff]  ;;  %v105_v22 = vld [vmem:[%s1231_s2 + $0x260] sm:$0xff]  ;;  %v122_v24 = vld [vmem:[%s1231_s2 + $0x2e8] sm:$0xff] }
  0x34   :  { %372 = vmatpush.msrb.mxu0 %v35_v38  ;;  %391 = vmatpush.msrb.mxu1 %v52_v39  ;;  %v155_v21 = vld [vmem:[%s1231_s2 + $0x3f0] sm:$0xff]  ;;  %v137_v25 = vld [vmem:[%s1231_s2 + $0x360] sm:$0xff]  ;;  %v22_v28 = vld [vmem:[%s1229_s0 + $0x8] sm:$0xff] }
  0x35   :  { %412 = vmatpush.msrb.mxu2 %v67_v40  ;;  %431 = vmatpush.msrb.mxu3 %v84_v41  ;;  %v349_v23 = vld.sshfl [vmem:[#allocation1 + $0x10] sm:$0xff pattern:$0x73625140]  ;;  %v347_v26 = vld.sshfl [vmem:[#allocation1] sm:$0xff pattern:$0x73625140] }
  0x36   :  { %373 = vmatpush.msrb.mxu0 %v34_v42  ;;  %392 = vmatpush.msrb.mxu1 %v51_v43  ;;  %v350_v27 = vld.sshfl [vmem:[#allocation1 + $0x18] sm:$0xff pattern:$0x73625140]  ;;  %v154_v30 = vld [vmem:[%s1231_s2 + $0x3e8] sm:$0xff]  ;;  %340 = vst [vmem:[#allocation1 + $0x20] ss:$4 sm:$0xff] %v22_v28 }
  0x37   :  { %413 = vmatpush.msrb.mxu2 %v66_v44  ;;  %432 = vmatpush.msrb.mxu3 %v83_v45  ;;  %v24_v29 = vld [vmem:[%s1229_s0 + $0x18] sm:$0xff]  ;;  %v26_v31 = vld [vmem:[%s1229_s0 + $0x28] sm:$0xff]  ;;  %v121_v34 = vld [vmem:[%s1231_s2 + $0x2e0] sm:$0xff] }
  0x38   :  { %374 = vmatpush.msrb.mxu0 %v33_v46  ;;  %393 = vmatpush.msrb.mxu1 %v50_v47  ;;  %v28_v32 = vld [vmem:[%s1229_s0 + $0x38] sm:$0xff]  ;;  %342 = vst [vmem:[#allocation1 + $0x21] ss:$4 sm:$0xff] %v24_v29  ;;  %v153_v36 = vld [vmem:[%s1231_s2 + $0x3e0] sm:$0xff]  ;;  %v103_v38 = vld [vmem:[%s1231_s2 + $0x250] sm:$0xff] }
  0x39   :  { %414 = vmatpush.msrb.mxu2 %v65_v48  ;;  %433 = vmatpush.msrb.mxu3 %v82_v49  ;;  %v104_v33 = vld [vmem:[%s1231_s2 + $0x258] sm:$0xff]  ;;  %344 = vst [vmem:[#allocation1 + $0x22] ss:$4 sm:$0xff] %v26_v31  ;;  %v348_v37 = vld.sshfl [vmem:[#allocation1 + $0x8] sm:$0xff pattern:$0x73625140] }
  0x3a   :  { %375 = vmatpush.msrb.mxu0 %v32_v50  ;;  %394 = vmatpush.msrb.mxu1 %v49_v58  ;;  %v136_v35 = vld [vmem:[%s1231_s2 + $0x358] sm:$0xff]  ;;  %346 = vst [vmem:[#allocation1 + $0x23] ss:$4 sm:$0xff] %v28_v32  ;;  %v135_v40 = vld [vmem:[%s1231_s2 + $0x350] sm:$0xff]  ;;  %v102_v42 = vld [vmem:[%s1231_s2 + $0x248] sm:$0xff] }
  0x3b   :  { %415 = vmatpush.msrb.mxu2 %v64_v59  ;;  %434 = vmatpush.msrb.mxu3 %v81_v61  ;;  %v120_v39 = vld [vmem:[%s1231_s2 + $0x2d8] sm:$0xff]  ;;  %v119_v43 = vld [vmem:[%s1231_s2 + $0x2d0] sm:$0xff]  ;;  %v134_v44 = vld [vmem:[%s1231_s2 + $0x348] sm:$0xff] }
  0x3c   :  { %376 = vmatpush.msrb.mxu0 %v31_v62  ;;  %395 = vmatpush.msrb.mxu1 %v48_v63  ;;  %v152_v41 = vld [vmem:[%s1231_s2 + $0x3d8] sm:$0xff]  ;;  %v151_v45 = vld [vmem:[%s1231_s2 + $0x3d0] sm:$0xff]  ;;  %v101_v46 = vld [vmem:[%s1231_s2 + $0x240] sm:$0xff] }
  0x3d   :  { %416 = vmatpush.msrb.mxu2 %v63_v0  ;;  %435 = vmatpush.msrb.mxu3 %v80_v1  ;;  %v118_v47 = vld [vmem:[%s1231_s2 + $0x2c8] sm:$0xff]  ;;  %v133_v48 = vld [vmem:[%s1231_s2 + $0x340] sm:$0xff]  ;;  %v100_v50 = vld [vmem:[%s1231_s2 + $0x238] sm:$0xff] }
  0x3e   :  { %377 = vmatpush.msrb.mxu0 %v30_v2  ;;  %396 = vmatpush.msrb.mxu1 %v47_v3  ;;  %v150_v49 = vld [vmem:[%s1231_s2 + $0x3c8] sm:$0xff]  ;;  %v117_v51 = vld [vmem:[%s1231_s2 + $0x2c0] sm:$0xff]  ;;  %v132_v52 = vld [vmem:[%s1231_s2 + $0x338] sm:$0xff] }
  0x3f   :  { %417 = vmatpush.msrb.mxu2 %v62_v4  ;;  %436 = vmatpush.msrb.mxu3 %v79_v5  ;;  %v149_v53 = vld [vmem:[%s1231_s2 + $0x3c0] sm:$0xff]  ;;  %v98_v58 = vld [vmem:[%s1231_s2 + $0x228] sm:$0xff]  ;;  %v115_v59 = vld [vmem:[%s1231_s2 + $0x2b0] sm:$0xff] }
  0x40   :  { %300 = vmatmul.f32.vlgmr.msra.gmra.mxu2 %v238_v54  ;;  %378 = vmatpush.msrb.mxu0 %v29_v6  ;;  %v99_v54 = vld [vmem:[%s1231_s2 + $0x230] sm:$0xff]  ;;  %v130_v60 = vld [vmem:[%s1231_s2 + $0x328] sm:$0xff]  ;;  %v97_v62 = vld [vmem:[%s1231_s2 + $0x220] sm:$0xff] }
  0x41   :  { %397 = vmatpush.msrb.mxu1 %v46_v7  ;;  %418 = vmatpush.msrb.mxu2 %v61_v8  ;;  %v147_v61 = vld [vmem:[%s1231_s2 + $0x3b0] sm:$0xff]  ;;  %v114_v63 = vld [vmem:[%s1231_s2 + $0x2a8] sm:$0xff]  ;;  %v129_v0 = vld [vmem:[%s1231_s2 + $0x320] sm:$0xff] }
  0x42   :  { %437 = vmatpush.msrb.mxu3 %v78_v9  ;;  %260 = vmatmul.f32.vlgmr.msra.gmra.mxu0 %v236_v55  ;;  %v116_v55 = vld [vmem:[%s1231_s2 + $0x2b8] sm:$0xff]  ;;  %v146_v1 = vld [vmem:[%s1231_s2 + $0x3a8] sm:$0xff]  ;;  %v113_v3 = vld [vmem:[%s1231_s2 + $0x2a0] sm:$0xff] }
  0x43   :  { %320 = vmatmul.f32.vlgmr.msra.gmra.mxu3 %v239_v56  ;;  %443 = vmatpush.msra.mxu0 %v108_v10  ;;  %v131_v56 = vld [vmem:[%s1231_s2 + $0x330] sm:$0xff]  ;;  %v96_v2 = vld [vmem:[%s1231_s2 + $0x218] sm:$0xff]  ;;  %v145_v5 = vld [vmem:[%s1231_s2 + $0x3a0] sm:$0xff] }
  0x44   :  { %483 = vmatpush.msra.mxu2 %v140_v11  ;;  %398 = vmatpush.msrb.mxu1 %v45_v12  ;;  %v128_v4 = vld [vmem:[%s1231_s2 + $0x318] sm:$0xff]  ;;  %v95_v6 = vld [vmem:[%s1231_s2 + $0x210] sm:$0xff]  ;;  %v94_v10 = vld [vmem:[%s1231_s2 + $0x208] sm:$0xff] }
  0x45   :  { %438 = vmatpush.msrb.mxu3 %v77_v13  ;;  %280 = vmatmul.f32.vlgmr.msra.gmra.mxu1 %v237_v57  ;;  %v148_v57 = vld [vmem:[%s1231_s2 + $0x3b8] sm:$0xff]  ;;  %v127_v8 = vld [vmem:[%s1231_s2 + $0x310] sm:$0xff]  ;;  %v126_v12 = vld [vmem:[%s1231_s2 + $0x308] sm:$0xff] }
  0x46   :  { %444 = vmatpush.msra.mxu0 %v107_v14  ;;  %463 = vmatpush.msra.mxu1 %v124_v15  ;;  %v112_v7 = vld [vmem:[%s1231_s2 + $0x298] sm:$0xff]  ;;  %v111_v11 = vld [vmem:[%s1231_s2 + $0x290] sm:$0xff]  ;;  %v93_v14 = vld [vmem:[%s1231_s2 + $0x200] sm:$0xff] }
  0x47   :  { %484 = vmatpush.msra.mxu2 %v139_v16  ;;  %503 = vmatpush.msra.mxu3 %v156_v17  ;;  %v144_v9 = vld [vmem:[%s1231_s2 + $0x398] sm:$0xff]  ;;  %v143_v13 = vld [vmem:[%s1231_s2 + $0x390] sm:$0xff]  ;;  %v110_v15 = vld [vmem:[%s1231_s2 + $0x288] sm:$0xff] }
  0x48   :  { %445 = vmatpush.msra.mxu0 %v106_v18  ;;  %464 = vmatpush.msra.mxu1 %v123_v19  ;;  %v125_v16 = vld [vmem:[%s1231_s2 + $0x300] sm:$0xff]  ;;  %v142_v17 = vld [vmem:[%s1231_s2 + $0x388] sm:$0xff]  ;;  %v353_v19 = vld.sshfl [vmem:[#allocation1 + $0x30] sm:$0xff pattern:$0x73625140] }
  0x49   :  { %485 = vmatpush.msra.mxu2 %v138_v20  ;;  %504 = vmatpush.msra.mxu3 %v155_v21  ;;  %v351_v18 = vld.sshfl [vmem:[#allocation1 + $0x20] sm:$0xff pattern:$0x73625140] }
  0x4a   :  { %419 = vmatmul.f32.vlgmr.msrb.gmra.mxu2 %v349_v23  ;;  %446 = vmatpush.msra.mxu0 %v105_v22  ;;  %v109_v20 = vld [vmem:[%s1231_s2 + $0x280] sm:$0xff]  ;;  %v352_v22 = vld.sshfl [vmem:[#allocation1 + $0x28] sm:$0xff pattern:$0x73625140] }
  0x4b   :  { %465 = vmatpush.msra.mxu1 %v122_v24  ;;  %486 = vmatpush.msra.mxu2 %v137_v25  ;;  %v141_v21 = vld [vmem:[%s1231_s2 + $0x380] sm:$0xff]  ;;  %v354_v23 = vld.sshfl [vmem:[#allocation1 + $0x38] sm:$0xff pattern:$0x73625140] }
  0x4c   :  { %505 = vmatpush.msra.mxu3 %v154_v30  ;;  %379 = vmatmul.f32.vlgmr.msrb.gmra.mxu0 %v347_v26 }
  0x4d   :  { %439 = vmatmul.f32.vlgmr.msrb.gmra.mxu3 %v350_v27  ;;  %447 = vmatpush.msra.mxu0 %v104_v33 }
  0x4e   :  { %466 = vmatpush.msra.mxu1 %v121_v34  ;;  %487 = vmatpush.msra.mxu2 %v136_v35 }
  0x4f   :  { %506 = vmatpush.msra.mxu3 %v153_v36  ;;  %399 = vmatmul.f32.vlgmr.msrb.gmra.mxu1 %v348_v37 }
  0x50   :  { %448 = vmatpush.msra.mxu0 %v103_v38  ;;  %467 = vmatpush.msra.mxu1 %v120_v39 }
  0x51   :  { %488 = vmatpush.msra.mxu2 %v135_v40  ;;  %507 = vmatpush.msra.mxu3 %v152_v41 }
  0x52   :  { %449 = vmatpush.msra.mxu0 %v102_v42  ;;  %468 = vmatpush.msra.mxu1 %v119_v43 }
  0x53   :  { %489 = vmatpush.msra.mxu2 %v134_v44  ;;  %508 = vmatpush.msra.mxu3 %v151_v45  ;;  %v551_v45 = vld [vmem:[%s1233_s4] ss:$0 sm:$0xff] }
  0x54   :  { %450 = vmatpush.msra.mxu0 %v101_v46  ;;  %469 = vmatpush.msra.mxu1 %v118_v47 }
  0x55   :  { %490 = vmatpush.msra.mxu2 %v133_v48  ;;  %509 = vmatpush.msra.mxu3 %v150_v49 }
  0x56   :  { %451 = vmatpush.msra.mxu0 %v100_v50  ;;  %470 = vmatpush.msra.mxu1 %v117_v51 }
  0x57   :  { %491 = vmatpush.msra.mxu2 %v132_v52  ;;  %510 = vmatpush.msra.mxu3 %v149_v53 }
  0x58   :  { %452 = vmatpush.msra.mxu0 %v99_v54  ;;  %471 = vmatpush.msra.mxu1 %v116_v55 }
  0x59   :  { %492 = vmatpush.msra.mxu2 %v131_v56  ;;  %511 = vmatpush.msra.mxu3 %v148_v57 }
  0x5a   :  { %453 = vmatpush.msra.mxu0 %v98_v58  ;;  %472 = vmatpush.msra.mxu1 %v115_v59 }
  0x5b   :  { %493 = vmatpush.msra.mxu2 %v130_v60  ;;  %512 = vmatpush.msra.mxu3 %v147_v61 }
  0x5c   :  { %454 = vmatpush.msra.mxu0 %v97_v62  ;;  %473 = vmatpush.msra.mxu1 %v114_v63 }
  0x5d   :  { %494 = vmatpush.msra.mxu2 %v129_v0  ;;  %513 = vmatpush.msra.mxu3 %v146_v1 }
  0x5e   :  { %455 = vmatpush.msra.mxu0 %v96_v2  ;;  %474 = vmatpush.msra.mxu1 %v113_v3 }
  0x5f   :  { %495 = vmatpush.msra.mxu2 %v128_v4  ;;  %514 = vmatpush.msra.mxu3 %v145_v5 }
  0x60   :  { %456 = vmatpush.msra.mxu0 %v95_v6  ;;  %475 = vmatpush.msra.mxu1 %v112_v7 }
  0x61   :  { %496 = vmatpush.msra.mxu2 %v127_v8  ;;  %515 = vmatpush.msra.mxu3 %v144_v9 }
  0x62   :  { %457 = vmatpush.msra.mxu0 %v94_v10  ;;  %476 = vmatpush.msra.mxu1 %v111_v11 }
  0x63   :  { %497 = vmatpush.msra.mxu2 %v126_v12  ;;  %516 = vmatpush.msra.mxu3 %v143_v13 }
  0x64   :  { %458 = vmatpush.msra.mxu0 %v93_v14  ;;  %477 = vmatpush.msra.mxu1 %v110_v15 }
  0x65   :  { %498 = vmatpush.msra.mxu2 %v125_v16  ;;  %517 = vmatpush.msra.mxu3 %v142_v17 }
  0x66   :  { %459 = vmatmul.f32.vlgmr.msra.gmra.mxu0 %v351_v18  ;;  %499 = vmatmul.f32.vlgmr.msra.gmra.mxu2 %v353_v19 }
  0x67   :  { %478 = vmatpush.msra.mxu1 %v109_v20  ;;  %518 = vmatpush.msra.mxu3 %v141_v21 }
  0x68   :  { %479 = vmatmul.f32.vlgmr.msra.gmra.mxu1 %v352_v22  ;;  %519 = vmatmul.f32.vlgmr.msra.gmra.mxu3 %v354_v23 }
  0xbf   :  { %v261_v25 = vpop.f32.mrf.mxu0 }
  0xc2   :  { %v281_v24 = vpop.f32.mrf.mxu1 }
  0xc3   :  { %v282_v26 = vadd.f32 %v281_v24, %v261_v25  ;;  %v301_v27 = vpop.f32.mrf.mxu2 }
  0xc5   :  { %v302_v28 = vadd.f32 %v301_v27, %v282_v26 }
  0xc6   :  { %v321_v29 = vpop.f32.mrf.mxu3 }
  0xc7   :  { %v322_v30 = vadd.f32 %v321_v29, %v302_v28 }
  0xc9   :  { %v380_v31 = vpop.f32.mrf.mxu0 }
  0xca   :  { %v381_v32 = vadd.f32 %v380_v31, %v322_v30 }
  0xcc   :  { %v400_v33 = vpop.f32.mrf.mxu1 }
  0xcd   :  { %v401_v34 = vadd.f32 %v400_v33, %v381_v32  ;;  %v420_v35 = vpop.f32.mrf.mxu2 }
  0xcf   :  { %v421_v36 = vadd.f32 %v420_v35, %v401_v34 }
  0xd0   :  { %v440_v37 = vpop.f32.mrf.mxu3 }
  0xd1   :  { %v441_v38 = vadd.f32 %v440_v37, %v421_v36 }
  0xe3   :  { %v460_v39 = vpop.f32.mrf.mxu0 }
  0xe4   :  { %v461_v40 = vadd.f32 %v460_v39, %v441_v38 }
  0xe5   :  { %v480_v41 = vpop.f32.mrf.mxu1 }
  0xe6   :  { %v481_v42 = vadd.f32 %v480_v41, %v461_v40 }
  0xe9   :  { %v500_v43 = vpop.f32.mrf.mxu2 }
  0xea   :  { %v501_v44 = vadd.f32 %v500_v43, %v481_v42 }
  0xeb   :  { %v520_v46 = vpop.f32.mrf.mxu3 }
  0xec   :  { %v521_v47 = vadd.f32 %v520_v46, %v501_v44 }
  0xee   :  { %v527_v48 = vadd.f32 %v551_v45, %v521_v47 }
  0xf0   :  { %529 = vst.msk [vmem:[#allocation2] sm:$0xff] %vm528_vm0, %v527_v48 }
  0xf1   :  { %533 = vsyncadd [#allocation3], 96  ;;  %s536_s7 = sshll.u32 %s1234_s5, 4  ;;  %s578_s3 = smov [#allocation2]   ;;  %s537_s7 = int_to_ptr.hbm [resolvable:$true] %s536_s7 }
  0xf2   :  { %s534_s1 = sshll.u32 %s578_s3, 4  ;;  %s579_s8 = smov 32   ;;  %s535_s1 = int_to_ptr.vmem [resolvable:$true] %s534_s1 }
  0xf3   :  { %s580_s9 = smov 2  }
  0xf4   :  { %542 = dma.vmem_to_hbm [thread:$0]  %s535_s1, 32, %s537_s7, [#allocation3], %s579_s8, %s579_s8, %s580_s9  }
  0xf5   :  { %576 = dma.done.wait [#allocation3], 128  }
  0xf6   :  { %577 = vsyncadd [#allocation3], 4294967168 }
  0xf7   :  { %547 = vsyncpa [#allocation3], 1 }

</bundles_post_ra>
